<compile_context>
chip_gen: v7x
topology: tpu7x:2x2x1
jax: 0.10.0
libtpu: 0.0.40
codegen_flags: <defaults>
</compile_context>

<pallas_src>
import jax
import jax.numpy as jnp
from jax.experimental import pallas as pl
from jax.experimental.pallas import tpu as pltpu


def _wkv7_kernel(r_ref, w_ref, k_ref, v_ref, a_ref, b_ref, s0_ref,
                 x_ref, s_ref):
    # Initialise the VMEM-resident state block from the incoming state at the
    # first time chunk of this head block.
    @pl.when(pl.program_id(1) == 0)
    def _init():
        s_ref[...] = s0_ref[...].astype(jnp.float32)

    ct = r_ref.shape[0]  # static chunk length

    @pl.loop(0, ct)
    def _step(t):
        S = s_ref[...]                                  # (hb, D, D) f32
        r_t = r_ref[t].astype(jnp.float32)              # (hb, D)
        w_t = w_ref[t].astype(jnp.float32)
        k_t = k_ref[t].astype(jnp.float32)
        v_t = v_ref[t].astype(jnp.float32)
        a_t = a_ref[t].astype(jnp.float32)
        b_t = b_ref[t].astype(jnp.float32)

        # sa[h, p] = sum_q S[h, p, q] * a[h, q]            (S @ a)
        sa = jnp.sum(S * a_t[:, None, :], axis=-1, keepdims=True)   # (hb, D, 1)
        # S = S * diag(w) + sa b^T + v k^T
        S = (S * w_t[:, None, :]
             + sa * b_t[:, None, :]
             + v_t[:, :, None] * k_t[:, None, :])
        s_ref[...] = S
        # x[h, p] = sum_q S[h, p, q] * r[h, q]             (S @ r)
        x_t = jnp.sum(S * r_t[:, None, :], axis=-1)                  # (hb, D)
        x_ref[t] = x_t.astype(x_ref.dtype)


def _pick_head_block(num_heads, head_size, budget_bytes=128 * 1024):
    """Largest head block dividing H that satisfies the (8,128) sublane rule
    (hb == H or hb % 8 == 0) and keeps the f32 state block modest; prefer a
    split into >=2 blocks so the 'parallel' head axis can use both v7x TCs."""
    fitting = [h for h in range(1, num_heads + 1)
               if num_heads % h == 0
               and (h == num_heads or h % 8 == 0)
               and h * head_size * head_size * 4 <= budget_bytes]
    if not fitting:
        return num_heads
    multi = [h for h in fitting if h < num_heads]
    return max(multi) if multi else max(fitting)


def wkv7(seq_length, r, w, k, v, a, b, state2, *, num_heads, head_size,
         chunk=128):
    """Forward pass of the RWKV-v7 Wkv7 module. Returns (x, state2_out) with
    x of shape (seq_length, num_heads, 1, head_size)."""
    T, H, D = int(seq_length), int(num_heads), int(head_size)

    def as_thd(arr):
        return jnp.reshape(arr, (T, H, D))

    r3, w3, k3, v3, a3, b3 = (as_thd(arr) for arr in (r, w, k, v, a, b))
    s0 = jnp.reshape(state2, (H, D, D)).astype(jnp.float32)

    # Time chunking: big chunks (amortise per-grid-step overhead); pad ragged
    # tail with state-preserving values (w=1, k=v=a=b=0 -> S unchanged).
    ct = min(chunk, T)
    num_chunks = pl.cdiv(T, ct)
    Tp = num_chunks * ct
    if Tp != T:
        pad = Tp - T
        padz = lambda x: jnp.pad(x, ((0, pad), (0, 0), (0, 0)))
        r3, k3, v3, a3, b3 = (padz(arr) for arr in (r3, k3, v3, a3, b3))
        w3 = jnp.pad(w3, ((0, pad), (0, 0), (0, 0)), constant_values=1.0)

    hb = _pick_head_block(H, D)
    grid = (H // hb, num_chunks)

    t_spec = pl.BlockSpec((ct, hb, D), lambda h, c: (c, h, 0))
    s_spec = pl.BlockSpec((hb, D, D), lambda h, c: (h, 0, 0))

    x_pad, s_out = pl.pallas_call(
        _wkv7_kernel,
        out_shape=(
            jax.ShapeDtypeStruct((Tp, H, D), r3.dtype),
            jax.ShapeDtypeStruct((H, D, D), jnp.float32),
        ),
        grid_spec=pltpu.PrefetchScalarGridSpec(
            num_scalar_prefetch=0,
            grid=grid,
            in_specs=[t_spec, t_spec, t_spec, t_spec, t_spec, t_spec, s_spec],
            out_specs=(t_spec, s_spec),
        ),
        compiler_params=pltpu.CompilerParams(
            dimension_semantics=("parallel", "arbitrary"),
        ),
    )(r3, w3, k3, v3, a3, b3, s0)

    x = x_pad[:T].reshape(T, H, 1, D)
    return x, s_out.astype(state2.dtype)


def _wkv7_reference(seq_length, r, w, k, v, a, b, state2, *, num_heads,
                    head_size):
    """Pure-JAX mirror of the PyTorch seq_length>1 loop (for testing)."""
    T, H, D = int(seq_length), num_heads, head_size
    r, w, k, v, a, b = (jnp.reshape(arr, (T, H, D)).astype(jnp.float32)
                        for arr in (r, w, k, v, a, b))
    S = jnp.reshape(state2, (H, D, D)).astype(jnp.float32)
    xs = []
    for t in range(T):
        sa = jnp.einsum("hpq,hq->hp", S, a[t])
        S = (S * w[t][:, None, :]
             + sa[:, :, None] * b[t][:, None, :]
             + v[t][:, :, None] * k[t][:, None, :])
        xs.append(jnp.einsum("hpq,hq->hp", S, r[t]))
    x = jnp.stack(xs, axis=0).reshape(T, H, 1, D)
    return x, S


if __name__ == "__main__":
    key = jax.random.PRNGKey(0)
    T, H, D = 8, 4, 32   # seq_length=8, num_heads=4, head_size=32
    keys = jax.random.split(key, 7)
    r = jax.random.normal(keys[0], (T, H * D), dtype=jnp.float32)
    k = jax.random.normal(keys[1], (T, H * D), dtype=jnp.float32)
    v = jax.random.normal(keys[2], (T, H * D), dtype=jnp.float32)
    a = 0.5 * jax.random.normal(keys[3], (T, H * D), dtype=jnp.float32)
    b = 0.5 * jax.random.normal(keys[4], (T, H * D), dtype=jnp.float32)
    # Decay in (0, 1), as produced by RWKV-7's w = exp(-exp(...)).
    w = jnp.exp(-jnp.exp(jax.random.normal(keys[5], (T, H * D),
                                           dtype=jnp.float32)))
    state2 = 0.1 * jax.random.normal(keys[6], (H, D, D), dtype=jnp.float32)

    x, s_out = wkv7(T, r, w, k, v, a, b, state2, num_heads=H, head_size=D)
    x = jax.block_until_ready(x)
    s_out = jax.block_until_ready(s_out)

    x_ref, s_ref = _wkv7_reference(T, r, w, k, v, a, b, state2,
                                   num_heads=H, head_size=D)

    assert x.shape == (T, H, 1, D), x.shape
    assert s_out.shape == (H, D, D), s_out.shape
    assert float(jnp.max(jnp.abs(x - x_ref))) < 1e-3
    assert float(jnp.max(jnp.abs(s_out - s_ref))) < 1e-3
    print("KERNEL_OK")
</pallas_src>

<mosaic_0001>
module attributes {stable_mosaic.version = 11 : i64} {
  func.func @_wkv7_kernel(%arg0: i32, %arg1: i32, %arg2: memref<8x4x32xf32, #tpu.memory_space<vmem>>, %arg3: memref<8x4x32xf32, #tpu.memory_space<vmem>>, %arg4: memref<8x4x32xf32, #tpu.memory_space<vmem>>, %arg5: memref<8x4x32xf32, #tpu.memory_space<vmem>>, %arg6: memref<8x4x32xf32, #tpu.memory_space<vmem>>, %arg7: memref<8x4x32xf32, #tpu.memory_space<vmem>>, %arg8: memref<4x32x32xf32, #tpu.memory_space<vmem>>, %arg9: memref<8x4x32xf32, #tpu.memory_space<vmem>>, %arg10: memref<4x32x32xf32, #tpu.memory_space<vmem>>) attributes {dimension_semantics = [#tpu.dimension_semantics<parallel>, #tpu.dimension_semantics<arbitrary>], iteration_bounds = array<i64: 1, 1>, scalar_prefetch = 0 : i64, scratch_operands = 0 : i64, tpu.core_type = #tpu.core_type<tc>, window_params = [{transform_indices = @transform_0, window_bounds = array<i64: 8, 4, 32>}, {transform_indices = @transform_1, window_bounds = array<i64: 8, 4, 32>}, {transform_indices = @transform_2, window_bounds = array<i64: 8, 4, 32>}, {transform_indices = @transform_3, window_bounds = array<i64: 8, 4, 32>}, {transform_indices = @transform_4, window_bounds = array<i64: 8, 4, 32>}, {transform_indices = @transform_5, window_bounds = array<i64: 8, 4, 32>}, {transform_indices = @transform_6, window_bounds = array<i64: 4, 32, 32>}, {transform_indices = @transform_7, window_bounds = array<i64: 8, 4, 32>}, {transform_indices = @transform_8, window_bounds = array<i64: 4, 32, 32>}]} {
    %c0_i32 = arith.constant 0 : i32
    %0 = arith.cmpi eq, %arg1, %c0_i32 : i32
    %1 = arith.extui %0 : i1 to i32
    %c0_i32_0 = arith.constant 0 : i32
    %2 = arith.cmpi ne, %1, %c0_i32_0 : i32
    scf.if %2 {
      %c0 = arith.constant 0 : index
      %c0_3 = arith.constant 0 : index
      %c0_4 = arith.constant 0 : index
      %4 = vector.load %arg8[%c0, %c0_3, %c0_4] : memref<4x32x32xf32, #tpu.memory_space<vmem>>, vector<4x32x32xf32>
      %c0_5 = arith.constant 0 : index
      %c0_6 = arith.constant 0 : index
      %c0_7 = arith.constant 0 : index
      %5 = vector.load %arg10[%c0_5, %c0_6, %c0_7] : memref<4x32x32xf32, #tpu.memory_space<vmem>>, vector<4x32x32xf32>
      tpu.vector_store %arg10[%c0_5, %c0_6, %c0_7], %4 {strides = array<i32>} : memref<4x32x32xf32, #tpu.memory_space<vmem>>, vector<4x32x32xf32>,
    } else {
    }
    %c0_i32_1 = arith.constant 0 : i32
    %c8_i32 = arith.constant 8 : i32
    %3 = arith.addi %c0_i32_1, %c8_i32 : i32
    %c1_i32 = arith.constant 1 : i32
    scf.for %arg11 = %c0_i32_1 to %3 step %c1_i32  : i32 {
      %c1_i32_3 = arith.constant 1 : i32
      %4 = arith.muli %arg11, %c1_i32_3 : i32
      %c0_i32_4 = arith.constant 0 : i32
      %5 = arith.addi %c0_i32_4, %4 : i32
      %c0 = arith.constant 0 : index
      %c0_5 = arith.constant 0 : index
      %c0_6 = arith.constant 0 : index
      %6 = vector.load %arg10[%c0, %c0_5, %c0_6] : memref<4x32x32xf32, #tpu.memory_space<vmem>>, vector<4x32x32xf32>
      %7 = arith.index_cast %5 : i32 to index
      %c0_7 = arith.constant 0 : index
      %c0_8 = arith.constant 0 : index
      %8 = vector.load %arg2[%7, %c0_7, %c0_8] : memref<8x4x32xf32, #tpu.memory_space<vmem>>, vector<1x4x32xf32>
      %9 = vector.shape_cast %8 : vector<1x4x32xf32> to vector<4x32xf32>
      %10 = arith.index_cast %5 : i32 to index
      %c0_9 = arith.constant 0 : index
      %c0_10 = arith.constant 0 : index
      %11 = vector.load %arg3[%10, %c0_9, %c0_10] : memref<8x4x32xf32, #tpu.memory_space<vmem>>, vector<1x4x32xf32>
      %12 = vector.shape_cast %11 : vector<1x4x32xf32> to vector<4x32xf32>
      %13 = arith.index_cast %5 : i32 to index
      %c0_11 = arith.constant 0 : index
      %c0_12 = arith.constant 0 : index
      %14 = vector.load %arg4[%13, %c0_11, %c0_12] : memref<8x4x32xf32, #tpu.memory_space<vmem>>, vector<1x4x32xf32>
      %15 = vector.shape_cast %14 : vector<1x4x32xf32> to vector<4x32xf32>
      %16 = arith.index_cast %5 : i32 to index
      %c0_13 = arith.constant 0 : index
      %c0_14 = arith.constant 0 : index
      %17 = vector.load %arg5[%16, %c0_13, %c0_14] : memref<8x4x32xf32, #tpu.memory_space<vmem>>, vector<1x4x32xf32>
      %18 = vector.shape_cast %17 : vector<1x4x32xf32> to vector<4x32xf32>
      %19 = arith.index_cast %5 : i32 to index
      %c0_15 = arith.constant 0 : index
      %c0_16 = arith.constant 0 : index
      %20 = vector.load %arg6[%19, %c0_15, %c0_16] : memref<8x4x32xf32, #tpu.memory_space<vmem>>, vector<1x4x32xf32>
      %21 = vector.shape_cast %20 : vector<1x4x32xf32> to vector<4x32xf32>
      %22 = arith.index_cast %5 : i32 to index
      %c0_17 = arith.constant 0 : index
      %c0_18 = arith.constant 0 : index
      %23 = vector.load %arg7[%22, %c0_17, %c0_18] : memref<8x4x32xf32, #tpu.memory_space<vmem>>, vector<1x4x32xf32>
      %24 = vector.shape_cast %23 : vector<1x4x32xf32> to vector<4x32xf32>
      %25 = vector.shape_cast %21 : vector<4x32xf32> to vector<4x1x32xf32>
      %26 = vector.broadcast %25 : vector<4x1x32xf32> to vector<4x32x32xf32>
      %27 = arith.mulf %6, %26 : vector<4x32x32xf32>
      %cst = arith.constant dense<0.000000e+00> : vector<4x32xf32>
      %28 = vector.multi_reduction <add>, %27, %cst [2] : vector<4x32x32xf32> to vector<4x32xf32>
      %29 = vector.shape_cast %28 : vector<4x32xf32> to vector<4x32x1xf32>
      %30 = vector.shape_cast %12 : vector<4x32xf32> to vector<4x1x32xf32>
      %31 = vector.broadcast %30 : vector<4x1x32xf32> to vector<4x32x32xf32>
      %32 = arith.mulf %6, %31 : vector<4x32x32xf32>
      %33 = vector.shape_cast %24 : vector<4x32xf32> to vector<4x1x32xf32>
      %34 = vector.broadcast %29 : vector<4x32x1xf32> to vector<4x32x32xf32>
      %35 = vector.broadcast %33 : vector<4x1x32xf32> to vector<4x32x32xf32>
      %36 = arith.mulf %34, %35 : vector<4x32x32xf32>
      %37 = arith.addf %32, %36 : vector<4x32x32xf32>
      %38 = vector.shape_cast %18 : vector<4x32xf32> to vector<4x32x1xf32>
      %39 = vector.shape_cast %15 : vector<4x32xf32> to vector<4x1x32xf32>
      %40 = vector.broadcast %38 : vector<4x32x1xf32> to vector<4x32x32xf32>
      %41 = vector.broadcast %39 : vector<4x1x32xf32> to vector<4x32x32xf32>
      %42 = arith.mulf %40, %41 : vector<4x32x32xf32>
      %43 = arith.addf %37, %42 : vector<4x32x32xf32>
      %c0_19 = arith.constant 0 : index
      %c0_20 = arith.constant 0 : index
      %c0_21 = arith.constant 0 : index
      %44 = vector.load %arg10[%c0_19, %c0_20, %c0_21] : memref<4x32x32xf32, #tpu.memory_space<vmem>>, vector<4x32x32xf32>
      tpu.vector_store %arg10[%c0_19, %c0_20, %c0_21], %43 {strides = array<i32>} : memref<4x32x32xf32, #tpu.memory_space<vmem>>, vector<4x32x32xf32>,
      %45 = vector.shape_cast %9 : vector<4x32xf32> to vector<4x1x32xf32>
      %46 = vector.broadcast %45 : vector<4x1x32xf32> to vector<4x32x32xf32>
      %47 = arith.mulf %43, %46 : vector<4x32x32xf32>
      %cst_22 = arith.constant dense<0.000000e+00> : vector<4x32xf32>
      %48 = vector.multi_reduction <add>, %47, %cst_22 [2] : vector<4x32x32xf32> to vector<4x32xf32>
      %49 = arith.index_cast %5 : i32 to index
      %c0_23 = arith.constant 0 : index
      %c0_24 = arith.constant 0 : index
      %50 = vector.load %arg9[%49, %c0_23, %c0_24] : memref<8x4x32xf32, #tpu.memory_space<vmem>>, vector<1x4x32xf32>
      %51 = vector.shape_cast %50 : vector<1x4x32xf32> to vector<4x32xf32>
      %52 = vector.shape_cast %48 : vector<4x32xf32> to vector<1x4x32xf32>
      tpu.vector_store %arg9[%49, %c0_23, %c0_24], %52 {strides = array<i32>} : memref<8x4x32xf32, #tpu.memory_space<vmem>>, vector<1x4x32xf32>,
    }
    %c8_i32_2 = arith.constant 8 : i32
    return
  }
  func.func @transform_0(%arg0: i32, %arg1: i32) -> (i32, i32, i32) {
    %c0_i32 = arith.constant 0 : i32
    %c0_i32_0 = arith.constant 0 : i32
    return %arg1, %arg0, %c0_i32 : i32, i32, i32
  }
  func.func @transform_1(%arg0: i32, %arg1: i32) -> (i32, i32, i32) {
    %c0_i32 = arith.constant 0 : i32
    %c0_i32_0 = arith.constant 0 : i32
    return %arg1, %arg0, %c0_i32 : i32, i32, i32
  }
  func.func @transform_2(%arg0: i32, %arg1: i32) -> (i32, i32, i32) {
    %c0_i32 = arith.constant 0 : i32
    %c0_i32_0 = arith.constant 0 : i32
    return %arg1, %arg0, %c0_i32 : i32, i32, i32
  }
  func.func @transform_3(%arg0: i32, %arg1: i32) -> (i32, i32, i32) {
    %c0_i32 = arith.constant 0 : i32
    %c0_i32_0 = arith.constant 0 : i32
    return %arg1, %arg0, %c0_i32 : i32, i32, i32
  }
  func.func @transform_4(%arg0: i32, %arg1: i32) -> (i32, i32, i32) {
    %c0_i32 = arith.constant 0 : i32
    %c0_i32_0 = arith.constant 0 : i32
    return %arg1, %arg0, %c0_i32 : i32, i32, i32
  }
  func.func @transform_5(%arg0: i32, %arg1: i32) -> (i32, i32, i32) {
    %c0_i32 = arith.constant 0 : i32
    %c0_i32_0 = arith.constant 0 : i32
    return %arg1, %arg0, %c0_i32 : i32, i32, i32
  }
  func.func @transform_6(%arg0: i32, %arg1: i32) -> (i32, i32, i32) {
    %c0_i32 = arith.constant 0 : i32
    %c0_i32_0 = arith.constant 0 : i32
    %c0_i32_1 = arith.constant 0 : i32
    return %arg0, %c0_i32, %c0_i32_0 : i32, i32, i32
  }
  func.func @transform_7(%arg0: i32, %arg1: i32) -> (i32, i32, i32) {
    %c0_i32 = arith.constant 0 : i32
    %c0_i32_0 = arith.constant 0 : i32
    return %arg1, %arg0, %c0_i32 : i32, i32, i32
  }
  func.func @transform_8(%arg0: i32, %arg1: i32) -> (i32, i32, i32) {
    %c0_i32 = arith.constant 0 : i32
    %c0_i32_0 = arith.constant 0 : i32
    %c0_i32_1 = arith.constant 0 : i32
    return %arg0, %c0_i32, %c0_i32_0 : i32, i32, i32
  }
}

</mosaic_0001>

<bundles_post_ra>
// kernel: tpu_custom_call.1
= control target key start
LH: loop header
LB: loop body
LE: loop exit
PB: predicated region body
PF: predicated region fallthrough
CT: control target
= control target key end

     0   :  { %14 = vsyncpa [#allocation3], 0  ;;  %s1698_s0 = inlined_call_operand.hbm [shape: f32[8,4,32], index: 0, kind: input, shape index: {}]   ;;  %s1699_s1 = inlined_call_operand.hbm [shape: f32[8,4,32], index: 1, kind: input, shape index: {}]   ;;  %s1700_s2 = inlined_call_operand.hbm [shape: f32[8,4,32], index: 2, kind: input, shape index: {}]   ;;  %s1701_s3 = inlined_call_operand.hbm [shape: f32[8,4,32], index: 3, kind: input, shape index: {}]   ;;  %s1702_s4 = inlined_call_operand.hbm [shape: f32[8,4,32], index: 4, kind: input, shape index: {}]   ;;  %s1703_s5 = inlined_call_operand.hbm [shape: f32[8,4,32], index: 5, kind: input, shape index: {}]   ;;  %s1704_s6 = inlined_call_operand.hbm [shape: f32[4,32,32], index: 6, kind: input, shape index: {}]   ;;  %s1705_s7 = inlined_call_operand.hbm [shape: f32[8,4,32], index: 7, kind: output, shape index: {0}]   ;;  %s1706_s8 = inlined_call_operand.hbm [shape: f32[4,32,32], index: 8, kind: output, shape index: {1}]  }
   0x1   :  { %15 = vsyncpa [#allocation6], 0 }
   0x2   :  { %16 = vsyncpa [#allocation9], 0 }
   0x3   :  { %17 = vsyncpa [#allocation12], 0 }
   0x4   :  { %18 = vsyncpa [#allocation4], 0 }
   0x5   :  { %19 = vsyncpa [#allocation16], 0  ;;  %s1134_s27 = smov [#allocation5]   ;;  %s1135_s29 = smov [#allocation8]  }
   0x6   :  { %s37_s28 = sshll.u32 %s1134_s27, 4  ;;  %s61_s30 = sshll.u32 %s1135_s29, 4  ;;  %s38_s28 = int_to_ptr.vmem [resolvable:$true] %s37_s28  ;;  %s1193_s30 = int_to_ptr.vmem [resolvable:$true] %s61_s30 }
   0x7   :  { %s916_s11 = scalar_lea.hbm %s1699_s1, 512 }
   0x8   :  { %p917_p0 = scmp.ne.s32.totalorder %s1699_s1, %s916_s11  ;;  %p920_p1 = scmp.lt.u32.totalorder %s916_s11, %s1699_s1 }
   0xa   :  { %p922_p2 = pnand %p920_p1, %p917_p0 }
   0xc   :  { %925 = shalt.err (!%p922_p2)
}
   0xd   :  { %s926_s16 = scalar_lea.vmem %s38_s28, 512  ;;  %p931_p4 = scmp.lt.s32.totalorder %s38_s28, %s38_s28 }
   0xe   :  { %p927_p3 = scmp.ne.s32.totalorder %s38_s28, %s926_s16  ;;  %p932_p5 = scmp.lt.s32.totalorder %s926_s16, %s926_s16 }
  0x10   :  { %p933_p6 = por %p932_p5, %p931_p4 }
  0x12   :  { %p934_p7 = pnand %p933_p6, %p927_p3 }
  0x14   :  { %937 = shalt.err (!%p934_p7)
}
  0x15   :  { %s1136_s17 = smov 64   ;;  %s1137_s18 = smov 4  }
  0x16   :  { %43 = dma.hbm_to_vmem [thread:$0]  %s1699_s1, 512, %s38_s28, [#allocation6], %s1136_s17, %s1136_s17, %s1137_s18  }
  0x17   :  { %s938_s23 = scalar_lea.hbm %s1701_s3, 512 }
  0x18   :  { %p939_p8 = scmp.ne.s32.totalorder %s1701_s3, %s938_s23  ;;  %p942_p9 = scmp.lt.u32.totalorder %s938_s23, %s1701_s3 }
  0x1a   :  { %p944_p10 = pnand %p942_p9, %p939_p8 }
  0x1c   :  { %947 = shalt.err (!%p944_p10)
}
  0x1d   :  { %s948_s29 = scalar_lea.vmem %s1193_s30, 512  ;;  %p953_p12 = scmp.lt.s32.totalorder %s1193_s30, %s1193_s30 }
  0x1e   :  { %p949_p11 = scmp.ne.s32.totalorder %s1193_s30, %s948_s29  ;;  %p954_p13 = scmp.lt.s32.totalorder %s948_s29, %s948_s29 }
  0x20   :  { %p955_p0 = por %p954_p13, %p953_p12 }
  0x22   :  { %p956_p1 = pnand %p955_p0, %p949_p11 }
  0x24   :  { %959 = shalt.err (!%p956_p1)
}
  0x25   :  { %67 = dma.hbm_to_vmem [thread:$0]  %s1701_s3, 512, %s1193_s30, [#allocation9], %s1136_s17, %s1136_s17, %s1137_s18  }
  0x26   :  { %s1138_s9 = smov [#allocation11]   ;;  %s1139_s11 = smov [#allocation2]  }
  0x27   :  { %s85_s10 = sshll.u32 %s1138_s9, 4  ;;  %s25_s12 = sshll.u32 %s1139_s11, 4  ;;  %s86_s10 = int_to_ptr.vmem [resolvable:$true] %s85_s10  ;;  %s1230_s12 = int_to_ptr.vmem [resolvable:$true] %s25_s12 }
  0x28   :  { %s960_s15 = scalar_lea.hbm %s1703_s5, 512 }
  0x29   :  { %p961_p2 = scmp.ne.s32.totalorder %s1703_s5, %s960_s15  ;;  %p964_p3 = scmp.lt.u32.totalorder %s960_s15, %s1703_s5 }
  0x2b   :  { %p966_p4 = pnand %p964_p3, %p961_p2 }
  0x2d   :  { %969 = shalt.err (!%p966_p4)
}
  0x2e   :  { %s970_s3 = scalar_lea.vmem %s86_s10, 512  ;;  %p975_p6 = scmp.lt.s32.totalorder %s86_s10, %s86_s10 }
  0x2f   :  { %p971_p5 = scmp.ne.s32.totalorder %s86_s10, %s970_s3  ;;  %p976_p7 = scmp.lt.s32.totalorder %s970_s3, %s970_s3 }
  0x31   :  { %p977_p8 = por %p976_p7, %p975_p6 }
  0x33   :  { %p978_p9 = pnand %p977_p8, %p971_p5 }
  0x35   :  { %981 = shalt.err (!%p978_p9)
}
  0x36   :  { %91 = dma.hbm_to_vmem [thread:$0]  %s1703_s5, 512, %s86_s10, [#allocation12], %s1136_s17, %s1136_s17, %s1137_s18  }
  0x37   :  { %s982_s25 = scalar_lea.hbm %s1698_s0, 512 }
  0x38   :  { %p983_p10 = scmp.ne.s32.totalorder %s1698_s0, %s982_s25  ;;  %p986_p11 = scmp.lt.u32.totalorder %s982_s25, %s1698_s0 }
  0x3a   :  { %p988_p12 = pnand %p986_p11, %p983_p10 }
  0x3c   :  { %991 = shalt.err (!%p988_p12)
}
  0x3d   :  { %s992_s28 = scalar_lea.vmem %s1230_s12, 512  ;;  %p997_p0 = scmp.lt.s32.totalorder %s1230_s12, %s1230_s12 }
  0x3e   :  { %p993_p13 = scmp.ne.s32.totalorder %s1230_s12, %s992_s28  ;;  %p998_p1 = scmp.lt.s32.totalorder %s992_s28, %s992_s28 }
  0x40   :  { %p999_p2 = por %p998_p1, %p997_p0 }
  0x42   :  { %p1000_p3 = pnand %p999_p2, %p993_p13 }
  0x44   :  { %1003 = shalt.err (!%p1000_p3)
}
  0x45   :  { %31 = dma.hbm_to_vmem [thread:$0]  %s1698_s0, 512, %s1230_s12, [#allocation3], %s1136_s17, %s1136_s17, %s1137_s18  }
  0x46   :  { %s1140_s10 = smov [#allocation7]   ;;  %s1141_s13 = smov [#allocation10]  }
  0x47   :  { %s49_s11 = sshll.u32 %s1140_s10, 4  ;;  %s73_s14 = sshll.u32 %s1141_s13, 4  ;;  %s50_s11 = int_to_ptr.vmem [resolvable:$true] %s49_s11  ;;  %s1267_s14 = int_to_ptr.vmem [resolvable:$true] %s73_s14 }
  0x48   :  { %s1004_s19 = scalar_lea.hbm %s1700_s2, 512 }
  0x49   :  { %p1005_p4 = scmp.ne.s32.totalorder %s1700_s2, %s1004_s19  ;;  %p1008_p5 = scmp.lt.u32.totalorder %s1004_s19, %s1700_s2 }
  0x4b   :  { %p1010_p6 = pnand %p1008_p5, %p1005_p4 }
  0x4d   :  { %1013 = shalt.err (!%p1010_p6)
}
  0x4e   :  { %s1014_s0 = scalar_lea.vmem %s50_s11, 512  ;;  %p1019_p8 = scmp.lt.s32.totalorder %s50_s11, %s50_s11 }
  0x4f   :  { %p1015_p7 = scmp.ne.s32.totalorder %s50_s11, %s1014_s0  ;;  %p1020_p9 = scmp.lt.s32.totalorder %s1014_s0, %s1014_s0 }
  0x51   :  { %p1021_p10 = por %p1020_p9, %p1019_p8 }
  0x53   :  { %p1022_p11 = pnand %p1021_p10, %p1015_p7 }
  0x55   :  { %1025 = shalt.err (!%p1022_p11)
}
  0x56   :  { %55 = dma.hbm_to_vmem [thread:$0]  %s1700_s2, 512, %s50_s11, [#allocation6], %s1136_s17, %s1136_s17, %s1137_s18  }
  0x57   :  { %s1026_s25 = scalar_lea.hbm %s1702_s4, 512 }
  0x58   :  { %p1027_p12 = scmp.ne.s32.totalorder %s1702_s4, %s1026_s25  ;;  %p1030_p13 = scmp.lt.u32.totalorder %s1026_s25, %s1702_s4 }
  0x5a   :  { %p1032_p0 = pnand %p1030_p13, %p1027_p12 }
  0x5c   :  { %1035 = shalt.err (!%p1032_p0)
}
  0x5d   :  { %s1036_s28 = scalar_lea.vmem %s1267_s14, 512  ;;  %p1041_p2 = scmp.lt.s32.totalorder %s1267_s14, %s1267_s14 }
  0x5e   :  { %p1037_p1 = scmp.ne.s32.totalorder %s1267_s14, %s1036_s28  ;;  %p1042_p3 = scmp.lt.s32.totalorder %s1036_s28, %s1036_s28 }
  0x60   :  { %p1043_p4 = por %p1042_p3, %p1041_p2 }
  0x62   :  { %p1044_p5 = pnand %p1043_p4, %p1037_p1 }
  0x64   :  { %1047 = shalt.err (!%p1044_p5)
}
  0x65   :  { %79 = dma.hbm_to_vmem [thread:$0]  %s1702_s4, 512, %s1267_s14, [#allocation9], %s1136_s17, %s1136_s17, %s1137_s18  }
  0x66   :  { %s1142_s9 = smov [#allocation13]   ;;  %s1048_s15 = scalar_lea.hbm %s1704_s6, 2048 }
  0x67   :  { %s97_s10 = sshll.u32 %s1142_s9, 4  ;;  %p1049_p6 = scmp.ne.s32.totalorder %s1704_s6, %s1048_s15  ;;  %s98_s10 = int_to_ptr.vmem [resolvable:$true] %s97_s10 }
  0x68   :  { %p1052_p7 = scmp.lt.u32.totalorder %s1048_s15, %s1704_s6 }
  0x6a   :  { %p1054_p8 = pnand %p1052_p7, %p1049_p6 }
  0x6c   :  { %1057 = shalt.err (!%p1054_p8)
}
  0x6d   :  { %s1058_s3 = scalar_lea.vmem %s98_s10, 2048  ;;  %p1063_p10 = scmp.lt.s32.totalorder %s98_s10, %s98_s10 }
  0x6e   :  { %p1059_p9 = scmp.ne.s32.totalorder %s98_s10, %s1058_s3  ;;  %p1064_p11 = scmp.lt.s32.totalorder %s1058_s3, %s1058_s3 }
  0x70   :  { %p1065_p12 = por %p1064_p11, %p1063_p10 }
  0x72   :  { %p1066_p13 = pnand %p1065_p12, %p1059_p9 }
  0x74   :  { %1069 = shalt.err (!%p1066_p13)
}
  0x75   :  { %s1143_s4 = smov 128   ;;  %s1144_s14 = smov 8  }
  0x76   :  { %103 = dma.hbm_to_vmem [thread:$0]  %s1704_s6, 2048, %s98_s10, [#allocation12], %s1143_s4, %s1143_s4, %s1144_s14  }
  0x77   :  { %1118 = dma.done.wait [#allocation3], 512  }
  0x78   :  { %1119 = vsyncadd [#allocation3], 4294966784 }
  0x79   :  { %1120 = dma.done.wait [#allocation6], 1024  }
  0x7a   :  { %1121 = vsyncadd [#allocation6], 4294966272 }
  0x7b   :  { %1122 = dma.done.wait [#allocation9], 1024  }
  0x7c   :  { %1123 = vsyncadd [#allocation9], 4294966272 }
  0x7d   :  { %1124 = dma.done.wait [#allocation12], 2560  }
  0x7e   :  { %1125 = vsyncadd [#allocation12], 4294964736  ;;  %vm145_vm0 = vcmask 261120   ;;  %v129_v0 = vld [vmem:[#allocation13] sm:$0xff]  ;;  %v130_v1 = vld [vmem:[#allocation13 + $0x8] sm:$0xff]  ;;  %s1335_s6 = smov 0  }
  0x7f   :  { %v131_v2 = vld [vmem:[#allocation13 + $0x10] sm:$0xff]  ;;  %146 = vst.msk [vmem:[#allocation15] sm:$0xff] %vm145_vm0, %v129_v0  ;;  %147 = vst.msk [vmem:[#allocation15 + $0x8] sm:$0xff] %vm145_vm0, %v130_v1  ;;  %v132_v3 = vld [vmem:[#allocation13 + $0x18] sm:$0xff] }
  0x80   :  { %148 = vst.msk [vmem:[#allocation15 + $0x10] sm:$0xff] %vm145_vm0, %v131_v2  ;;  %v133_v4 = vld [vmem:[#allocation13 + $0x20] sm:$0xff]  ;;  %v134_v5 = vld [vmem:[#allocation13 + $0x28] sm:$0xff]  ;;  %149 = vst.msk [vmem:[#allocation15 + $0x18] sm:$0xff] %vm145_vm0, %v132_v3 }
  0x81   :  { %150 = vst.msk [vmem:[#allocation15 + $0x20] sm:$0xff] %vm145_vm0, %v133_v4  ;;  %151 = vst.msk [vmem:[#allocation15 + $0x28] sm:$0xff] %vm145_vm0, %v134_v5  ;;  %v135_v6 = vld [vmem:[#allocation13 + $0x30] sm:$0xff]  ;;  %v136_v7 = vld [vmem:[#allocation13 + $0x38] sm:$0xff] }
  0x82   :  { %v137_v8 = vld [vmem:[#allocation13 + $0x40] sm:$0xff]  ;;  %152 = vst.msk [vmem:[#allocation15 + $0x30] sm:$0xff] %vm145_vm0, %v135_v6  ;;  %153 = vst.msk [vmem:[#allocation15 + $0x38] sm:$0xff] %vm145_vm0, %v136_v7  ;;  %v138_v9 = vld [vmem:[#allocation13 + $0x48] sm:$0xff] }
  0x83   :  { %154 = vst.msk [vmem:[#allocation15 + $0x40] sm:$0xff] %vm145_vm0, %v137_v8  ;;  %v139_v10 = vld [vmem:[#allocation13 + $0x50] sm:$0xff]  ;;  %v140_v11 = vld [vmem:[#allocation13 + $0x58] sm:$0xff]  ;;  %155 = vst.msk [vmem:[#allocation15 + $0x48] sm:$0xff] %vm145_vm0, %v138_v9 }
  0x84   :  { %156 = vst.msk [vmem:[#allocation15 + $0x50] sm:$0xff] %vm145_vm0, %v139_v10  ;;  %157 = vst.msk [vmem:[#allocation15 + $0x58] sm:$0xff] %vm145_vm0, %v140_v11  ;;  %v141_v12 = vld [vmem:[#allocation13 + $0x60] sm:$0xff]  ;;  %v142_v13 = vld [vmem:[#allocation13 + $0x68] sm:$0xff] }
  0x85   :  { %v143_v14 = vld [vmem:[#allocation13 + $0x70] sm:$0xff]  ;;  %158 = vst.msk [vmem:[#allocation15 + $0x60] sm:$0xff] %vm145_vm0, %v141_v12  ;;  %159 = vst.msk [vmem:[#allocation15 + $0x68] sm:$0xff] %vm145_vm0, %v142_v13  ;;  %v144_v15 = vld [vmem:[#allocation13 + $0x78] sm:$0xff] }
  0x86   :  { %160 = vst.msk [vmem:[#allocation15 + $0x70] sm:$0xff] %vm145_vm0, %v143_v14  ;;  %161 = vst.msk [vmem:[#allocation15 + $0x78] sm:$0xff] %vm145_vm0, %v144_v15 }
  0x87 LB: > { %v209_v16 = vlaneseq  ;;  %v1145_v17 = vmov 1966171168   ;;  %s1341_s12 = sshll.u32 %s1132_s6, 2  ;;  %v1353_v25 = vld [vmem:[#allocation15] sm:$0xff]  ;;  %v1359_v29 = vld [vmem:[#allocation15 + $0x8] sm:$0xff]  ;;  %v1369_v37 = vld [vmem:[#allocation15 + $0x10] sm:$0xff]  ;;  %s1132_s6 = sphi %s1335_s6, %s167_s6  }
  0x88   : > { %v207_v18 = vunpack.c.l.s4 %v1145_v17  ;;  %s193_s22 = scalar_lea.vmem [#allocation10], %s1341_s12  ;;  %v1357_v28 = vld [vmem:[#allocation15 + $0x20] sm:$0xff]  ;;  %v1361_v30 = vld [vmem:[#allocation15 + $0x28] sm:$0xff]  ;;  %v1379_v46 = vld [vmem:[#allocation15 + $0x18] sm:$0xff]  ;;  %s191_s23 = scalar_lea.vmem [#allocation8], %s1341_s12  ;;  %vm750_vm1 = vcmask 130112  }
  0x89   : > { %v1344_v19 = vshrl.u32 %v209_v16, 7  ;;  %v889_v21 = vld.sshfl [vmem:[%s193_s22] sm:$0x33 pattern:$0x75316420]  ;;  %v1371_v38 = vld [vmem:[#allocation15 + $0x30] sm:$0xff] }
  0x8a   : > { %v208_v20 = vunpack.c.0.s8 %v207_v18  ;;  %v205_v24 = vcombine.high %v889_v21, %v889_v21  ;;  %v1381_v47 = vld [vmem:[#allocation15 + $0x38] sm:$0xff]  ;;  %v1388_v54 = vld [vmem:[#allocation15 + $0x40] sm:$0xff]  ;;  %v1390_v55 = vld [vmem:[#allocation15 + $0x48] sm:$0xff]  ;;  %s187_s24 = scalar_lea.vmem [#allocation5], %s1341_s12  ;;  %s195_s25 = scalar_lea.vmem [#allocation11], %s1341_s12  ;;  %vm757_vm2 = vcmask 195712  }
  0x8b   : > { %v1351_v23 = vsub.s32 0, %v1344_v19  ;;  %v1397_v61 = vld [vmem:[#allocation15 + $0x50] sm:$0xff]  ;;  %v1407_v4 = vld [vmem:[#allocation15 + $0x58] sm:$0xff]  ;;  %v192_v18 = vld [vmem:[%s191_s23] sm:$0xf]  ;;  %s189_s26 = scalar_lea.vmem [#allocation7], %s1341_s12 }
  0x8c   : > { %v1348_v22 = vsub.s32 %v208_v20, %v1344_v19  ;;  %v1399_v62 = vld [vmem:[#allocation15 + $0x60] sm:$0xff]  ;;  %v1405_v3 = vld [vmem:[#allocation15 + $0x68] sm:$0xff]  ;;  %s185_s27 = scalar_lea.vmem [#allocation2], %s1341_s12  ;;  %vm764_vm3 = vcmask 261312   ;;  %vm823_vm4 = vcmask 1041409   ;;  %vm825_vm5 = vcmask 1042434  }
  0x8d   : > { %v1413_v9 = vld [vmem:[#allocation15 + $0x70] sm:$0xff]  ;;  %v1415_v10 = vld [vmem:[#allocation15 + $0x78] sm:$0xff]  ;;  %v448_v20 = vrot.slane %v192_v18, %v1351_v23  ;;  %vm827_vm6 = vcmask 1043459   ;;  %vm831_vm7 = vcmask 257024   ;;  %s830_s29 = scalar_lea.vmem [#allocation14], %s1341_s12  ;;  %s167_s6 = sadd.s32 1, %s1132_s6  }
  0x8e   : > { %v212_v26 = vrot.slane %v889_v21, %v1348_v22  ;;  %v219_v27 = vrot.slane %v205_v24, %v1348_v22  ;;  %v466_v21 = vsub.s32 1, %v1344_v19  ;;  %p164_p0 = scmp.ge.s32.totalorder %s167_s6, 8  }
  0x8f   :  { %s1146_s1 = smov (%p164_p0), [#allocation14]   ;;  %s1147_s2 = smov (%p164_p0), [#allocation15]  }
  0x90   : > { %v225_v31 = vrot.slane %v212_v26, %v1351_v23  ;;  %v229_v32 = vrot.slane %v219_v27, %v1351_v23  ;;  %v220_v41 = vcombine.high %v212_v26, %v212_v26  ;;  %v221_v49 = vcombine.high %v219_v27, %v219_v27  ;;  %s838_s28 = sshll.u32 (%p164_p0), %s1146_s1, 4  ;;  %s850_s5 = sshll.u32 (%p164_p0), %s1147_s2, 4  ;;  %s839_s28 = int_to_ptr.vmem [resolvable:$true] %s838_s28  ;;  %s1661_s5 = int_to_ptr.vmem [resolvable:$true] %s850_s5 }
  0x91   : > { %v467_v24 = vrot.slane %v192_v18, %v466_v21  ;;  %v485_v26 = vsub.s32 2, %v1344_v19  ;;  %s1070_s9 = scalar_lea.vmem (%p164_p0), %s839_s28, 512  ;;  %p1075_p2 = scmp.lt.s32.totalorder (%p164_p0), %s839_s28, %s839_s28 }
  0x92   : > { %v242_v33 = vmul.f32 %v225_v31, %v1353_v25  ;;  %v246_v34 = vmul.f32 %v229_v32, %v1357_v28  ;;  %v243_v35 = vmul.f32 %v225_v31, %v1359_v29  ;;  %v247_v36 = vmul.f32 %v229_v32, %v1361_v30  ;;  %p1071_p1 = scmp.ne.s32.totalorder (%p164_p0), %s839_s28, %s1070_s9  ;;  %p1076_p3 = scmp.lt.s32.totalorder (%p164_p0), %s1070_s9, %s1070_s9 }
  0x93   : > { %v244_v44 = vmul.f32 %v225_v31, %v1369_v37  ;;  %v248_v45 = vmul.f32 %v229_v32, %v1371_v38  ;;  %v245_v48 = vmul.f32 %v225_v31, %v1379_v46  ;;  %v249_v52 = vmul.f32 %v229_v32, %v1381_v47 }
  0x94   : > { %v259_v39 = vsel %vm145_vm0, %v242_v33, 0.0  ;;  %v271_v40 = vsel %vm145_vm0, %v246_v34, 0.0  ;;  %v262_v42 = vsel %vm145_vm0, %v243_v35, 0.0  ;;  %v274_v43 = vsel %vm145_vm0, %v247_v36, 0.0  ;;  %p1077_p4 = por (%p164_p0), %p1076_p3, %p1075_p2 }
  0x95   : > { %260 = vadd.xlane.f32.xlu0 %v259_v39  ;;  %272 = vadd.xlane.f32.xlu1 %v271_v40  ;;  %v265_v50 = vsel %vm145_vm0, %v244_v44, 0.0  ;;  %v277_v51 = vsel %vm145_vm0, %v248_v45, 0.0  ;;  %v233_v53 = vrot.slane %v220_v41, %v1351_v23  ;;  %v268_v56 = vsel %vm145_vm0, %v245_v48, 0.0 }
  0x96   : > { %v280_v57 = vsel %vm145_vm0, %v249_v52, 0.0  ;;  %v237_v60 = vrot.slane %v221_v49, %v1351_v23  ;;  %v486_v27 = vrot.slane %v192_v18, %v485_v26  ;;  %v504_v31 = vsub.s32 3, %v1344_v19  ;;  %v891_v48 = vld.sshfl [vmem:[%s195_s25] sm:$0x33 pattern:$0x75316420]  ;;  %p1078_p5 = pnand (%p164_p0), %p1077_p4, %p1071_p1 }
  0x97   : > { %v250_v58 = vmul.f32 %v233_v53, %v1388_v54  ;;  %v251_v59 = vmul.f32 %v233_v53, %v1390_v55  ;;  %v252_v1 = vmul.f32 %v233_v53, %v1397_v61  ;;  %v253_v8 = vmul.f32 %v233_v53, %v1407_v4 }
  0x98   : > { %v254_v2 = vmul.f32 %v237_v60, %v1399_v62  ;;  %v255_v7 = vmul.f32 %v237_v60, %v1405_v3  ;;  %v256_v13 = vmul.f32 %v237_v60, %v1413_v9  ;;  %v257_v14 = vmul.f32 %v237_v60, %v1415_v10 }
  0x99   : > { %263 = vadd.xlane.f32.xlu0 %v262_v42  ;;  %275 = vadd.xlane.f32.xlu1 %v274_v43  ;;  %v283_v63 = vsel %vm145_vm0, %v250_v58, 0.0  ;;  %v286_v0 = vsel %vm145_vm0, %v251_v59, 0.0  ;;  %v289_v5 = vsel %vm145_vm0, %v252_v1, 0.0  ;;  %v292_v12 = vsel %vm145_vm0, %v253_v8, 0.0 }
  0x9a   : > { %v295_v6 = vsel %vm145_vm0, %v254_v2, 0.0  ;;  %v298_v11 = vsel %vm145_vm0, %v255_v7, 0.0  ;;  %v301_v15 = vsel %vm145_vm0, %v256_v13, 0.0  ;;  %v304_v17 = vsel %vm145_vm0, %v257_v14, 0.0 }
  0x9b   : > { %v505_v32 = vrot.slane %v192_v18, %v504_v31  ;;  %v890_v43 = vld.sshfl [vmem:[%s187_s24] sm:$0x33 pattern:$0x75316420] }
  0x9c   : > { %v315_v49 = vcombine.high %v890_v43, %v890_v43  ;;  %v892_v58 = vld.sshfl [vmem:[%s189_s26] sm:$0x33 pattern:$0x75316420] }
  0x9d   : > { %266 = vadd.xlane.f32.xlu0 %v265_v50  ;;  %278 = vadd.xlane.f32.xlu1 %v277_v51  ;;  %v322_v50 = vrot.slane %v890_v43, %v1348_v22  ;;  %v376_v51 = vcombine.high %v891_v48, %v891_v48  ;;  %v529_v1 = vcombine.high %v892_v58, %v892_v58 }
  0x9f   : > { %v335_v59 = vrot.slane %v322_v50, %v1351_v23  ;;  %v1452_v60 = vrot.slane %v376_v51, %v1348_v22  ;;  %v330_v8 = vcombine.high %v322_v50, %v322_v50 }
  0xa1   : > { %269 = vadd.xlane.f32.xlu0 %v268_v56  ;;  %281 = vadd.xlane.f32.xlu1 %v280_v57  ;;  %v383_v56 = vrot.slane %v891_v48, %v1348_v22  ;;  %v1447_v57 = vrot.slane %v315_v49, %v1348_v22  ;;  %v1468_v13 = vrot.slane %v1452_v60, %v1351_v23 }
  0xa2   : > { %v353_v21 = vmul.f32 %v335_v59, %v1359_v29  ;;  %v354_v31 = vmul.f32 %v335_v59, %v1369_v37 }
  0xa3   : > { %v396_v2 = vrot.slane %v383_v56, %v1351_v23  ;;  %v1463_v7 = vrot.slane %v1447_v57, %v1351_v23 }
  0xa5   : > { %284 = vadd.xlane.f32.xlu0 %v283_v63  ;;  %287 = vadd.xlane.f32.xlu1 %v286_v0  ;;  %v356_v26 = vmul.f32 %v1463_v7, %v1357_v28 }
  0xa9   : > { %290 = vadd.xlane.f32.xlu0 %v289_v5  ;;  %296 = vadd.xlane.f32.xlu1 %v295_v6  ;;  %v536_v5 = vrot.slane %v892_v58, %v1348_v22  ;;  %v893_v6 = vld.sshfl [vmem:[%s185_s27] sm:$0x33 pattern:$0x75316420] }
  0xaa   : > { %v1478_v18 = vrot.slane %v893_v6, %v1348_v22 }
  0xab   : > { %v544_v43 = vcombine.high %v536_v5, %v536_v5 }
  0xac   : > { %v1500_v28 = vrot.slane %v1478_v18, %v1351_v23 }
  0xad   : > { %299 = vadd.xlane.f32.xlu0 %v298_v11  ;;  %293 = vadd.xlane.f32.xlu1 %v292_v12  ;;  %v622_v11 = vcombine.high %v893_v6, %v893_v6  ;;  %v352_v12 = vmul.f32 %v335_v59, %v1353_v25  ;;  %v1482_v25 = vrot.slane %v536_v5, %v1351_v23 }
  0xae   : > { %v1512_v6 = vrot.slane %v544_v43, %v1351_v23 }
  0xaf   : > { %v1491_v48 = vrot.slane %v622_v11, %v1348_v22 }
  0xb1   : > { %302 = vadd.xlane.f32.xlu0 %v301_v15  ;;  %305 = vadd.xlane.f32.xlu1 %v304_v17  ;;  %v1475_v17 = vrot.slane %v529_v1, %v1348_v22 }
  0xb3   : > { %v1496_v50 = vrot.slane %v1475_v17, %v1351_v23 }
  0xc2   : > { %454 = vbcast.lane.b32.xlu1 %v448_v20, 264 }
  0xc6   : > { %469 = vbcast.lane.b32.xlu1 %v467_v24, 256 }
  0xc7   : > { %450 = vbcast.lane.b32.xlu0 %v448_v20, 256 }
  0xca   : > { %473 = vbcast.lane.b32.xlu1 %v467_v24, 264 }
  0xcb   : > { %458 = vbcast.lane.b32.xlu0 %v448_v20, 272 }
  0xce   : > { %477 = vbcast.lane.b32.xlu1 %v467_v24, 272 }
  0xcf   : > { %488 = vbcast.lane.b32.xlu0 %v486_v27, 256 }
  0xd2   : > { %492 = vbcast.lane.b32.xlu1 %v486_v27, 264 }
  0xd3   : > { %462 = vbcast.lane.b32.xlu0 %v448_v20, 280 }
  0xd6   : > { %481 = vbcast.lane.b32.xlu1 %v467_v24, 280 }
  0xd7   : > { %496 = vbcast.lane.b32.xlu0 %v486_v27, 272 }
  0xda   : > { %507 = vbcast.lane.b32.xlu1 %v505_v32, 256 }
  0xdb   : > { %511 = vbcast.lane.b32.xlu0 %v505_v32, 264 }
  0xde   : > { %500 = vbcast.lane.b32.xlu1 %v486_v27, 280  ;;  %v391_v27 = vcombine.high %v383_v56, %v383_v56 }
  0xdf   : > { %515 = vbcast.lane.b32.xlu0 %v505_v32, 272 }
  0xe2   : > { %519 = vbcast.lane.b32.xlu1 %v505_v32, 280  ;;  %v1488_v32 = vrot.slane %v330_v8, %v1351_v23  ;;  %v1516_v8 = vrot.slane %v1491_v48, %v1351_v23 }
  0xe4   : > { %v360_v58 = vmul.f32 %v1488_v32, %v1388_v54 }
 0x122   : > { %v261_v33 = vpop.xlane.xlu0 %260  ;;  %v273_v34 = vpop.xlane.xlu1 %272 }
 0x123   : > { %v413_v20 = vmul.f32 %v396_v2, %v261_v33  ;;  %v417_v33 = vmul.f32 %v1468_v13, %v273_v34  ;;  %v357_v34 = vmul.f32 %v1463_v7, %v1361_v30 }
 0x125   : > { %v429_v37 = vadd.f32 %v413_v20, %v352_v12  ;;  %v433_v11 = vadd.f32 %v417_v33, %v356_v26 }
 0x126   : > { %v264_v35 = vpop.xlane.xlu0 %263  ;;  %v1428_v36 = vpop.xlane.xlu1 %275 }
 0x127   : > { %v414_v24 = vmul.f32 %v396_v2, %v264_v35  ;;  %v418_v12 = vmul.f32 %v1468_v13, %v1428_v36  ;;  %v358_v36 = vmul.f32 %v1463_v7, %v1371_v38 }
 0x129   : > { %v430_v51 = vadd.f32 %v414_v24, %v353_v21 }
 0x12a   : > { %v267_v39 = vpop.xlane.xlu0 %266  ;;  %v1430_v40 = vpop.xlane.xlu1 %278 }
 0x12b   : > { %v415_v29 = vmul.f32 %v396_v2, %v267_v39  ;;  %v1507_v39 = vrot.slane %v391_v27, %v1351_v23 }
 0x12d   : > { %v431_v30 = vadd.f32 %v415_v29, %v354_v31  ;;  %v355_v31 = vmul.f32 %v335_v59, %v1379_v46 }
 0x12e   : > { %v1432_v41 = vpop.xlane.xlu0 %269  ;;  %v1434_v42 = vpop.xlane.xlu1 %281 }
 0x132   : > { %v285_v44 = vpop.xlane.xlu0 %284  ;;  %v1437_v45 = vpop.xlane.xlu1 %287 }
 0x133   : > { %v421_v20 = vmul.f32 %v1507_v39, %v285_v44  ;;  %v331_v44 = vcombine.high %v1447_v57, %v1447_v57 }
 0x135   : > { %v437_v38 = vadd.f32 %v421_v20, %v360_v58 }
 0x136   : > { %v1441_v52 = vpop.xlane.xlu0 %290  ;;  %v1443_v53 = vpop.xlane.xlu1 %296 }
 0x13a   : > { %v1454_v63 = vpop.xlane.xlu0 %299  ;;  %v1456_v0 = vpop.xlane.xlu1 %293 }
 0x13e   : > { %v1470_v14 = vpop.xlane.xlu0 %302  ;;  %v1472_v15 = vpop.xlane.xlu1 %305 }
 0x142   : > { %v455_v35 = vpop.permute.xlu1 %454  ;;  %v451_v49 = vpop.permute.xlu0 %450 }
 0x143   : > { %v567_v56 = vmul.f32 %v1482_v25, %v455_v35  ;;  %v566_v22 = vmul.f32 %v1482_v25, %v451_v49 }
 0x145   : > { %v583_v1 = vadd.f32 %v567_v56, %v430_v51  ;;  %v582_v5 = vadd.f32 %v566_v22, %v429_v37  ;;  %v434_v37 = vadd.f32 %v418_v12, %v357_v34  ;;  %v419_v51 = vmul.f32 %v1468_v13, %v1430_v40 }
 0x146   : > { %v470_v21 = vpop.permute.xlu1 %469  ;;  %v459_v24 = vpop.permute.xlu0 %458  ;;  %v416_v56 = vmul.f32 %v396_v2, %v1432_v41  ;;  %v361_v40 = vmul.f32 %v1488_v32, %v1390_v55  ;;  %v392_v41 = vcombine.high %v1452_v60, %v1452_v60  ;;  %v1547_v2 = vrot.slane %v331_v44, %v1351_v23 }
 0x147   : > { %599 = vst.msk [vmem:[#allocation15 + $0x8] sm:$0xff] %vm145_vm0, %v583_v1  ;;  %598 = vst.msk [vmem:[#allocation15] sm:$0xff] %vm145_vm0, %v582_v5  ;;  %v570_v54 = vmul.f32 %v1496_v50, %v470_v21  ;;  %v568_v27 = vmul.f32 %v1482_v25, %v459_v24  ;;  %v660_v43 = vmul.f32 %v1500_v28, %v583_v1 }
 0x148   : > { %v659_v26 = vmul.f32 %v1500_v28, %v582_v5  ;;  %v362_v34 = vmul.f32 %v1488_v32, %v1397_v61  ;;  %v435_v12 = vadd.f32 %v419_v51, %v358_v36  ;;  %v423_v55 = vmul.f32 %v1507_v39, %v1441_v52 }
 0x149   : > { %v586_v33 = vadd.f32 %v570_v54, %v433_v11  ;;  %v584_v29 = vadd.f32 %v568_v27, %v431_v30  ;;  %v678_v35 = vsel %vm145_vm0, %v660_v43, 0.0  ;;  %v422_v30 = vmul.f32 %v1507_v39, %v1437_v45 }
 0x14a   : > { %v675_v49 = vsel %vm145_vm0, %v659_v26, 0.0  ;;  %v474_v22 = vpop.permute.xlu1 %473  ;;  %v489_v1 = vpop.permute.xlu0 %488  ;;  %679 = vadd.xlane.f32.xlu1 %v678_v35  ;;  %v545_v60 = vcombine.high %v1475_v17, %v1475_v17  ;;  %v432_v24 = vadd.f32 %v416_v56, %v355_v31  ;;  %v359_v52 = vmul.f32 %v1463_v7, %v1381_v47 }
 0x14b   : > { %676 = vadd.xlane.f32.xlu0 %v675_v49  ;;  %602 = vst.msk [vmem:[#allocation15 + $0x20] sm:$0xff] %vm145_vm0, %v586_v33  ;;  %600 = vst.msk [vmem:[#allocation15 + $0x10] sm:$0xff] %vm145_vm0, %v584_v29  ;;  %v571_v46 = vmul.f32 %v1496_v50, %v474_v22  ;;  %v574_v57 = vmul.f32 %v1512_v6, %v489_v1  ;;  %v663_v59 = vmul.f32 %v1516_v8, %v586_v33 }
 0x14c   : > { %v1566_v27 = vrot.slane %v392_v41, %v1351_v23  ;;  %v661_v43 = vmul.f32 %v1500_v28, %v584_v29  ;;  %v637_v17 = vcombine.high %v1478_v18, %v1478_v18  ;;  %v365_v26 = vmul.f32 %v1547_v2, %v1405_v3 }
 0x14d   : > { %v587_v58 = vadd.f32 %v571_v46, %v434_v37  ;;  %v590_v5 = vadd.f32 %v574_v57, %v437_v38  ;;  %v687_v11 = vsel %vm145_vm0, %v663_v59, 0.0  ;;  %v420_v44 = vmul.f32 %v1468_v13, %v1434_v42 }
 0x14e   : > { %v478_v20 = vpop.permute.xlu1 %477  ;;  %v463_v21 = vpop.permute.xlu0 %462  ;;  %v438_v33 = vadd.f32 %v422_v30, %v361_v40  ;;  %v439_v47 = vadd.f32 %v423_v55, %v362_v34  ;;  %v1577_v29 = vrot.slane %v545_v60, %v1351_v23  ;;  %v426_v18 = vmul.f32 %v1566_v27, %v1454_v63 }
 0x14f   : > { %688 = vadd.xlane.f32.xlu0 %v687_v11  ;;  %603 = vst.msk [vmem:[#allocation15 + $0x28] sm:$0xff] %vm145_vm0, %v587_v58  ;;  %606 = vst.msk [vmem:[#allocation15 + $0x40] sm:$0xff] %vm145_vm0, %v590_v5  ;;  %v572_v61 = vmul.f32 %v1496_v50, %v478_v20  ;;  %v569_v54 = vmul.f32 %v1482_v25, %v463_v21  ;;  %v664_v45 = vmul.f32 %v1516_v8, %v587_v58 }
 0x150   : > { %v364_v13 = vmul.f32 %v1547_v2, %v1399_v62  ;;  %v681_v37 = vsel %vm145_vm0, %v661_v43, 0.0  ;;  %v1590_v51 = vrot.slane %v637_v17, %v1351_v23  ;;  %v436_v38 = vadd.f32 %v420_v44, %v359_v52 }
 0x151   : > { %v588_v36 = vadd.f32 %v572_v61, %v435_v12  ;;  %v585_v31 = vadd.f32 %v569_v54, %v432_v24  ;;  %v690_v25 = vsel %vm145_vm0, %v664_v45, 0.0  ;;  %v425_v46 = vmul.f32 %v1566_v27, %v1443_v53 }
 0x152   : > { %v493_v7 = vpop.permute.xlu1 %492  ;;  %v497_v35 = vpop.permute.xlu0 %496  ;;  %v366_v57 = vmul.f32 %v1547_v2, %v1413_v9  ;;  %v442_v40 = vadd.f32 %v426_v18, %v365_v26  ;;  %v427_v41 = vmul.f32 %v1566_v27, %v1470_v14  ;;  %v667_v53 = vmul.f32 %v1590_v51, %v590_v5 }
 0x153   : > { %691 = vadd.xlane.f32.xlu0 %v690_v25  ;;  %604 = vst.msk [vmem:[#allocation15 + $0x30] sm:$0xff] %vm145_vm0, %v588_v36  ;;  %601 = vst.msk [vmem:[#allocation15 + $0x18] sm:$0xff] %vm145_vm0, %v585_v31  ;;  %v575_v3 = vmul.f32 %v1512_v6, %v493_v7  ;;  %v576_v49 = vmul.f32 %v1512_v6, %v497_v35  ;;  %v665_v42 = vmul.f32 %v1516_v8, %v588_v36 }
 0x154   : > { %v662_v1 = vmul.f32 %v1500_v28, %v585_v31  ;;  %v638_v9 = vcombine.high %v1491_v48, %v1491_v48  ;;  %v441_v30 = vadd.f32 %v425_v46, %v364_v13  ;;  %v363_v14 = vmul.f32 %v1488_v32, %v1407_v4 }
 0x155   : > { %v591_v56 = vadd.f32 %v575_v3, %v438_v33  ;;  %v592_v63 = vadd.f32 %v576_v49, %v439_v47  ;;  %v693_v22 = vsel %vm145_vm0, %v665_v42, 0.0  ;;  %v424_v55 = vmul.f32 %v1507_v39, %v1456_v0 }
 0x156   : > { %v482_v59 = vpop.permute.xlu1 %481  ;;  %v512_v62 = vpop.permute.xlu0 %511  ;;  %694 = vadd.xlane.f32.xlu1 %v693_v22  ;;  %v684_v12 = vsel %vm145_vm0, %v662_v1, 0.0  ;;  %v443_v21 = vadd.f32 %v427_v41, %v366_v57  ;;  %v699_v24 = vsel %vm145_vm0, %v667_v53, 0.0  ;;  %v654_v0 = vrot.slane %v638_v9, %v1351_v23 }
 0x157   : > { %682 = vadd.xlane.f32.xlu0 %v681_v37  ;;  %607 = vst.msk [vmem:[#allocation15 + $0x48] sm:$0xff] %vm145_vm0, %v591_v56  ;;  %608 = vst.msk [vmem:[#allocation15 + $0x50] sm:$0xff] %vm145_vm0, %v592_v63  ;;  %v573_v28 = vmul.f32 %v1496_v50, %v482_v59  ;;  %v579_v34 = vmul.f32 %v1577_v29, %v512_v62  ;;  %v668_v4 = vmul.f32 %v1590_v51, %v591_v56 }
 0x158   : > { %v669_v54 = vmul.f32 %v1590_v51, %v592_v63  ;;  %v440_v52 = vadd.f32 %v424_v55, %v363_v14  ;;  %v367_v43 = vmul.f32 %v1547_v2, %v1415_v10  ;;  %v740_v63 = vand.u32 127, %v209_v16 }
 0x159   : > { %v589_v58 = vadd.f32 %v573_v28, %v436_v38  ;;  %v595_v11 = vadd.f32 %v579_v34, %v442_v40  ;;  %v702_v36 = vsel %vm145_vm0, %v668_v4, 0.0 }
 0x15a   : > { %v508_v20 = vpop.permute.xlu1 %507  ;;  %v516_v50 = vpop.permute.xlu0 %515  ;;  %v705_v31 = vsel %vm145_vm0, %v669_v54, 0.0  ;;  %v745_v38 = vadd.s32 4294967288, %v740_v63  ;;  %v752_v46 = vadd.s32 4294967280, %v740_v63  ;;  %v759_v62 = vadd.s32 4294967272, %v740_v63 }
 0x15b   : > { %685 = vadd.xlane.f32.xlu0 %v684_v12  ;;  %605 = vst.msk [vmem:[#allocation15 + $0x38] sm:$0xff] %vm145_vm0, %v589_v58  ;;  %611 = vst.msk [vmem:[#allocation15 + $0x68] sm:$0xff] %vm145_vm0, %v595_v11  ;;  %v578_v48 = vmul.f32 %v1577_v29, %v508_v20  ;;  %v580_v5 = vmul.f32 %v1577_v29, %v516_v50  ;;  %v666_v60 = vmul.f32 %v1516_v8, %v589_v58 }
 0x15c   : > { %v428_v8 = vmul.f32 %v1566_v27, %v1472_v15  ;;  %v672_v17 = vmul.f32 %v654_v0, %v595_v11  ;;  %v748_v40 = vsub.s32 %v745_v38, %v1344_v19  ;;  %v755_v41 = vsub.s32 %v752_v46, %v1344_v19 }
 0x15d   : > { %v594_v32 = vadd.f32 %v578_v48, %v441_v30  ;;  %v596_v39 = vadd.f32 %v580_v5, %v443_v21  ;;  %v696_v61 = vsel %vm145_vm0, %v666_v60, 0.0  ;;  %v743_v28 = vsub.s32 %v740_v63, %v1344_v19 }
 0x15e   : > { %v501_v45 = vpop.permute.xlu1 %500  ;;  %697 = vadd.xlane.f32.xlu1 %v696_v61  ;;  %v444_v10 = vadd.f32 %v428_v8, %v367_v43  ;;  %v714_v2 = vsel %vm145_vm0, %v672_v17, 0.0  ;;  %v762_v16 = vsub.s32 %v759_v62, %v1344_v19 }
 0x15f   : > { %700 = vadd.xlane.f32.xlu0 %v699_v24  ;;  %610 = vst.msk [vmem:[#allocation15 + $0x60] sm:$0xff] %vm145_vm0, %v594_v32  ;;  %612 = vst.msk [vmem:[#allocation15 + $0x70] sm:$0xff] %vm145_vm0, %v596_v39  ;;  %v577_v23 = vmul.f32 %v1512_v6, %v501_v45  ;;  %v671_v25 = vmul.f32 %v654_v0, %v594_v32  ;;  %v673_v33 = vmul.f32 %v654_v0, %v596_v39 }
 0x161   : > { %v593_v26 = vadd.f32 %v577_v23, %v440_v52  ;;  %v711_v6 = vsel %vm145_vm0, %v671_v25, 0.0  ;;  %v717_v7 = vsel %vm145_vm0, %v673_v33, 0.0 }
 0x162   : > { %v520_v44 = vpop.permute.xlu1 %519  ;;  %703 = vadd.xlane.f32.xlu1 %v702_v36 }
 0x163   : > { %706 = vadd.xlane.f32.xlu0 %v705_v31  ;;  %609 = vst.msk [vmem:[#allocation15 + $0x58] sm:$0xff] %vm145_vm0, %v593_v26  ;;  %v581_v15 = vmul.f32 %v1577_v29, %v520_v44  ;;  %v670_v47 = vmul.f32 %v1590_v51, %v593_v26 }
 0x165   : > { %v597_v27 = vadd.f32 %v581_v15, %v444_v10  ;;  %v708_v35 = vsel %vm145_vm0, %v670_v47, 0.0 }
 0x166   : > { %712 = vadd.xlane.f32.xlu1 %v711_v6 }
 0x167   : > { %715 = vadd.xlane.f32.xlu0 %v714_v2  ;;  %613 = vst.msk [vmem:[#allocation15 + $0x78] sm:$0xff] %vm145_vm0, %v597_v27  ;;  %v674_v18 = vmul.f32 %v654_v0, %v597_v27 }
 0x169   : > { %v720_v29 = vsel %vm145_vm0, %v674_v18, 0.0 }
 0x16a   : > { %709 = vadd.xlane.f32.xlu1 %v708_v35 }
 0x16b   : > { %718 = vadd.xlane.f32.xlu0 %v717_v7 }
 0x16e   : > { %721 = vadd.xlane.f32.xlu1 %v720_v29 }
 0x1d7   : > { %v680_v13 = vpop.xlane.xlu1 %679 }
 0x1d8   : > { %v677_v3 = vpop.xlane.xlu0 %676  ;;  %v749_v14 = vrot.slane %v680_v13, %v748_v40 }
 0x1d9   : > { %v744_v55 = vrot.slane %v677_v3, %v743_v28 }
 0x1db   : > { %v751_v54 = vsel %vm750_vm1, %v749_v14, %v744_v55 }
 0x1dc   : > { %v689_v49 = vpop.xlane.xlu0 %688 }
 0x1dd   : > { %v769_v11 = vrot.slane %v689_v49, %v743_v28 }
 0x1e0   : > { %v692_v42 = vpop.xlane.xlu0 %691 }
 0x1e1   : > { %v773_v34 = vrot.slane %v692_v42, %v748_v40 }
 0x1e3   : > { %v695_v51 = vpop.xlane.xlu1 %694  ;;  %v774_v21 = vsel %vm750_vm1, %v773_v34, %v769_v11 }
 0x1e4   : > { %v683_v37 = vpop.xlane.xlu0 %682  ;;  %v778_v12 = vrot.slane %v695_v51, %v755_v41 }
 0x1e5   : > { %v756_v48 = vrot.slane %v683_v37, %v755_v41 }
 0x1e6   : > { %v779_v19 = vsel %vm757_vm2, %v778_v12, %v774_v21 }
 0x1e7   : > { %v758_v43 = vsel %vm757_vm2, %v756_v48, %v751_v54 }
 0x1e8   : > { %v686_v56 = vpop.xlane.xlu0 %685 }
 0x1e9   : > { %v763_v4 = vrot.slane %v686_v56, %v762_v16 }
 0x1eb   : > { %v698_v22 = vpop.xlane.xlu1 %697  ;;  %v765_v17 = vsel %vm764_vm3, %v763_v4, %v758_v43 }
 0x1ec   : > { %v701_v1 = vpop.xlane.xlu0 %700  ;;  %v783_v20 = vrot.slane %v698_v22, %v762_v16 }
 0x1ed   : > { %v788_v30 = vrot.slane %v701_v1, %v743_v28 }
 0x1ee   : > { %v784_v45 = vsel %vm764_vm3, %v783_v20, %v779_v19 }
 0x1ef   : > { %v704_v57 = vpop.xlane.xlu1 %703  ;;  %v824_v31 = vsel %vm823_vm4, %v784_v45, %v765_v17 }
 0x1f0   : > { %v707_v59 = vpop.xlane.xlu0 %706  ;;  %v792_v53 = vrot.slane %v704_v57, %v748_v40 }
 0x1f1   : > { %v797_v50 = vrot.slane %v707_v59, %v755_v41 }
 0x1f2   : > { %v793_v5 = vsel %vm750_vm1, %v792_v53, %v788_v30 }
 0x1f3   : > { %v713_v58 = vpop.xlane.xlu1 %712  ;;  %v798_v52 = vsel %vm757_vm2, %v797_v50, %v793_v5 }
 0x1f4   : > { %v716_v9 = vpop.xlane.xlu0 %715  ;;  %v807_v32 = vrot.slane %v713_v58, %v743_v28 }
 0x1f5   : > { %v811_v0 = vrot.slane %v716_v9, %v748_v40 }
 0x1f7   : > { %v710_v24 = vpop.xlane.xlu1 %709  ;;  %v812_v26 = vsel %vm750_vm1, %v811_v0, %v807_v32 }
 0x1f8   : > { %v719_v60 = vpop.xlane.xlu0 %718  ;;  %v802_v39 = vrot.slane %v710_v24, %v762_v16 }
 0x1f9   : > { %v816_v61 = vrot.slane %v719_v60, %v755_v41 }
 0x1fa   : > { %v803_v8 = vsel %vm764_vm3, %v802_v39, %v798_v52  ;;  %166 = sbr.rel (!%p164_p0) target bundleno = 135 (0x87), region = 102 }
 0x1fb   : > { %v722_v23 = vpop.xlane.xlu1 %721  ;;  %v817_v25 = vsel %vm757_vm2, %v816_v61, %v812_v26  ;;  %v826_v44 = vsel %vm825_vm5, %v803_v8, %v824_v31 }
 0x1fc   : > { %v821_v36 = vrot.slane %v722_v23, %v762_v16 }
 0x1fe   : > { %v822_v10 = vsel %vm764_vm3, %v821_v36, %v817_v25 }
 0x1ff   : > { %v828_v15 = vsel %vm827_vm6, %v822_v10, %v826_v44 }
 0x200   : > { %832 = vst.msk [vmem:[%s830_s29] sm:$0xf] %vm831_vm7, %v828_v15 }
 0x201   :  { %1081 = shalt.err (!%p1078_p5)
}
 0x202   :  { %s1082_s13 = scalar_lea.hbm %s1705_s7, 512 }
 0x203   :  { %p1083_p6 = scmp.ne.s32.totalorder %s1705_s7, %s1082_s13  ;;  %p1086_p7 = scmp.lt.u32.totalorder %s1082_s13, %s1705_s7 }
 0x205   :  { %p1088_p8 = pnand %p1086_p7, %p1083_p6 }
 0x207   :  { %1091 = shalt.err (!%p1088_p8)
}
 0x208   :  { %844 = dma.vmem_to_hbm [thread:$0]  %s839_s28, 512, %s1705_s7, [#allocation4], %s1136_s17, %s1136_s17, %s1137_s18  }
 0x209   :  { %s1092_s30 = scalar_lea.vmem %s1661_s5, 2048  ;;  %p1097_p10 = scmp.lt.s32.totalorder %s1661_s5, %s1661_s5 }
 0x20a   :  { %p1093_p9 = scmp.ne.s32.totalorder %s1661_s5, %s1092_s30  ;;  %p1098_p11 = scmp.lt.s32.totalorder %s1092_s30, %s1092_s30 }
 0x20c   :  { %p1099_p12 = por %p1098_p11, %p1097_p10 }
 0x20e   :  { %p1100_p13 = pnand %p1099_p12, %p1093_p9 }
 0x210   :  { %1103 = shalt.err (!%p1100_p13)
}
 0x211   :  { %s1104_s12 = scalar_lea.hbm %s1706_s8, 2048 }
 0x212   :  { %p1105_p0 = scmp.ne.s32.totalorder %s1706_s8, %s1104_s12  ;;  %p1108_p1 = scmp.lt.u32.totalorder %s1104_s12, %s1706_s8 }
 0x214   :  { %p1110_p2 = pnand %p1108_p1, %p1105_p0 }
 0x216   :  { %1113 = shalt.err (!%p1110_p2)
}
 0x217   :  { %856 = dma.vmem_to_hbm [thread:$0]  %s1661_s5, 2048, %s1706_s8, [#allocation16], %s1143_s4, %s1143_s4, %s1144_s14  }
 0x218   :  { %1126 = dma.done.wait [#allocation4], 512  }
 0x219   :  { %1127 = vsyncadd [#allocation4], 4294966784 }
 0x21a   :  { %1128 = dma.done.wait [#allocation16], 2048  }
 0x21b   :  { %1129 = vsyncadd [#allocation16], 4294965248 }
 0x21c   :  { %863 = vsyncpa [#allocation3], 1 }
 0x21d   :  { %864 = vsyncpa [#allocation6], 1 }
 0x21e   :  { %865 = vsyncpa [#allocation9], 1 }
 0x21f   :  { %866 = vsyncpa [#allocation12], 1 }
 0x220   :  { %867 = vsyncpa [#allocation4], 1 }
 0x221   :  { %868 = vsyncpa [#allocation16], 1 }

</bundles_post_ra>
